<compile_context>
chip_gen: v7x
topology: tpu7x:2x2x1
jax: 0.10.0
libtpu: 0.0.40
codegen_flags: <defaults>
</compile_context>

<pallas_src>
import functools
import inspect

import jax
import jax.numpy as jnp
from jax.experimental import pallas as pl
from jax.experimental.pallas import tpu as pltpu

LANE = 128

# Resolved lazily on the first forward call: does this Pallas build support
# single-buffering the VMEM-resident weights via pipeline_mode=pl.Buffered(1)?
_WEIGHT_SINGLE_BUFFER = None


def _round_up(n, m):
    return ((n + m - 1) // m) * m


def mlp_kernel(x_ref, w1_ref, b1_ref, w2_ref, b2_ref, w3_ref, b3_ref,
               w4_ref, b4_ref, o_ref, *, compute_dtype):
    """Fused 4-layer MLP.

    MXU matmuls accumulate in f32; bias-add + ReLU run in f32 on the VPU
    (v5e has no bf16 VALU). Activations stay in values — no scratch
    store/load round-trips between layers.
    """
    f32 = jnp.float32
    h = x_ref[...].astype(compute_dtype)
    h = jnp.maximum(
        jnp.dot(h, w1_ref[...], preferred_element_type=f32) + b1_ref[...], 0.0)
    h = jnp.maximum(
        jnp.dot(h.astype(compute_dtype), w2_ref[...],
                preferred_element_type=f32) + b2_ref[...], 0.0)
    h = jnp.maximum(
        jnp.dot(h.astype(compute_dtype), w3_ref[...],
                preferred_element_type=f32) + b3_ref[...], 0.0)
    o_ref[...] = (
        jnp.dot(h.astype(compute_dtype), w4_ref[...],
                preferred_element_type=f32) + b4_ref[...]
    ).astype(o_ref.dtype)


def prepare_params(params, *, compute_dtype=jnp.bfloat16):
    """One-time parameter prep (hoisted out of the forward hot path).

    Weights are cast to the MXU compute dtype and the hidden dims are zero-
    padded to the 128-lane width (lane-dense inter-layer activations, full MXU
    depth). Biases stay f32 (bias-add/ReLU run in f32). Input/output feature
    dims are left at their logical sizes so x / out need no per-call padding
    or slicing.
    """
    w1, w2, w3, w4 = params["w1"], params["w2"], params["w3"], params["w4"]
    b1, b2, b3, b4 = params["b1"], params["b2"], params["b3"], params["b4"]
    in_size, hid = w1.shape
    out_size = w4.shape[1]
    hid_p = _round_up(hid, LANE)

    def pad2(a, rows, cols, dtype):
        a = a.astype(dtype)
        return jnp.pad(a, ((0, rows - a.shape[0]), (0, cols - a.shape[1])))

    return {
        "w1": pad2(w1, in_size, hid_p, compute_dtype),
        "w2": pad2(w2, hid_p, hid_p, compute_dtype),
        "w3": pad2(w3, hid_p, hid_p, compute_dtype),
        "w4": pad2(w4, hid_p, out_size, compute_dtype),
        "b1": pad2(b1, 1, hid_p, jnp.float32),
        "b2": pad2(b2, 1, hid_p, jnp.float32),
        "b3": pad2(b3, 1, hid_p, jnp.float32),
        "b4": b4.astype(jnp.float32),
    }


def simple_nn_forward(x, prepped, *, block_b=512):
    """x: (B, input_size); prepped: output of prepare_params()."""
    global _WEIGHT_SINGLE_BUFFER

    w1, b1 = prepped["w1"], prepped["b1"]
    w2, b2 = prepped["w2"], prepped["b2"]
    w3, b3 = prepped["w3"], prepped["b3"]
    w4, b4 = prepped["w4"], prepped["b4"]

    B, in_size = x.shape
    assert in_size == w1.shape[0]
    out_size = w4.shape[1]
    compute_dtype = w1.dtype

    # Batch tile: large enough to amortize the ~0.35us per-grid-step overhead,
    # capped at ceil(B/2) for larger B so the "parallel" batch axis gives both
    # v7x TensorCores work. A ragged last tile is handled by Pallas block
    # masking — no per-call jnp.pad pass over x.
    tb = min(block_b, _round_up(B, 8))
    if B >= 16:
        tb = min(tb, _round_up(-(-B // 2), 8))
    tb = max(8, _round_up(tb, 8))
    nb = -(-B // tb)

    weights = (w1, b1, w2, b2, w3, b3, w4, b4)

    # Explicit scoped-VMEM budget: resident weights (x2 in case they end up
    # double-buffered) + double-buffered, lane-padded x/out tiles + headroom.
    itemsize = jnp.dtype(x.dtype).itemsize
    resident_bytes = sum(int(a.size) * jnp.dtype(a.dtype).itemsize for a in weights)
    tile_bytes = 2 * tb * (_round_up(in_size, LANE) + _round_up(out_size, LANE)) * itemsize
    vmem_limit = int(min(max(2 * resident_bytes + tile_bytes + (8 << 20), 16 << 20),
                         64 << 20))
    # TODO(synk): add a K/N-tiled fallback (reduction grid axis + f32 accumulator
    # scratch) for hidden sizes where the resident weights exceed ~half of v7x's
    # 64 MiB VMEM.

    def run(single_buffer):
        def resident_spec(shape):
            # Constant index_map -> weights stay VMEM-resident across batch
            # tiles (no re-DMA); single-buffer them when supported.
            if single_buffer:
                return pl.BlockSpec(shape, lambda i: (0, 0),
                                    pipeline_mode=pl.Buffered(1))
            return pl.BlockSpec(shape, lambda i: (0, 0))

        call = pl.pallas_call(
            functools.partial(mlp_kernel, compute_dtype=compute_dtype),
            out_shape=jax.ShapeDtypeStruct((B, out_size), x.dtype),
            grid=(nb,),
            in_specs=[pl.BlockSpec((tb, in_size), lambda i: (i, 0))]
            + [resident_spec(a.shape) for a in weights],
            out_specs=pl.BlockSpec((tb, out_size), lambda i: (i, 0)),
            compiler_params=pltpu.CompilerParams(
                dimension_semantics=("parallel",),
                vmem_limit_bytes=vmem_limit),
        )
        return call(x, *weights)

    if _WEIGHT_SINGLE_BUFFER is None:
        supported = hasattr(pl, "Buffered") and (
            "pipeline_mode" in inspect.signature(pl.BlockSpec).parameters)
        if supported:
            try:
                out = jax.block_until_ready(run(True))
                _WEIGHT_SINGLE_BUFFER = True
                return out
            except Exception:
                # Older Pallas: fall back to default (double-buffered) specs.
                _WEIGHT_SINGLE_BUFFER = False
        else:
            _WEIGHT_SINGLE_BUFFER = False
    return run(_WEIGHT_SINGLE_BUFFER)


def init_params(key, input_size, hidden_size, output_size):
    """Deterministic init mimicking nn.Linear's uniform(-1/sqrt(fan_in), ...)."""
    ks = jax.random.split(key, 8)

    def linear(kw, kb, fan_in, fan_out):
        bound = 1.0 / jnp.sqrt(jnp.float32(fan_in))
        w = jax.random.uniform(kw, (fan_in, fan_out), jnp.float32, -bound, bound)
        b = jax.random.uniform(kb, (1, fan_out), jnp.float32, -bound, bound)
        return w, b

    w1, b1 = linear(ks[0], ks[1], input_size, hidden_size)
    w2, b2 = linear(ks[2], ks[3], hidden_size, hidden_size)
    w3, b3 = linear(ks[4], ks[5], hidden_size, hidden_size)
    w4, b4 = linear(ks[6], ks[7], hidden_size, output_size)
    return {"w1": w1, "b1": b1, "w2": w2, "b2": b2,
            "w3": w3, "b3": b3, "w4": w4, "b4": b4}


def reference_forward(x, p):
    h = jnp.maximum(x @ p["w1"] + p["b1"], 0.0)
    h = jnp.maximum(h @ p["w2"] + p["b2"], 0.0)
    h = jnp.maximum(h @ p["w3"] + p["b3"], 0.0)
    return h @ p["w4"] + p["b4"]


if __name__ == "__main__":
    key = jax.random.PRNGKey(0)
    k_x, k_p = jax.random.split(key)

    batch, input_size, hidden_size, output_size = 8, 16, 32, 8
    x = jax.random.normal(k_x, (batch, input_size), jnp.float32)
    params = init_params(k_p, input_size, hidden_size, output_size)

    ref = reference_forward(x, params)

    # f32 compute path (tight check against the f32 reference).
    prepped_f32 = prepare_params(params, compute_dtype=jnp.float32)
    out = jax.block_until_ready(simple_nn_forward(x, prepped_f32))
    assert out.shape == (batch, output_size)
    assert jnp.allclose(out, ref, atol=1e-5, rtol=1e-5)

    # Default path: bf16 weights/activations on the MXU, f32 accumulation
    # (v5e/v6e/v7x fast path). Prep is one-time; forward reuses it.
    prepped_bf16 = prepare_params(params)
    out_bf16 = jax.block_until_ready(simple_nn_forward(x, prepped_bf16))
    assert out_bf16.shape == (batch, output_size)
    assert bool(jnp.all(jnp.isfinite(out_bf16)))
    assert jnp.allclose(out_bf16, ref, atol=1e-1, rtol=5e-2)

    print("KERNEL_OK")
</pallas_src>

<mosaic_0001>
module attributes {stable_mosaic.version = 11 : i64} {
  func.func @mlp_kernel(%arg0: i32, %arg1: memref<8x16xf32, #tpu.memory_space<vmem>>, %arg2: memref<16x128xf32, #tpu.memory_space<vmem>>, %arg3: memref<1x128xf32, #tpu.memory_space<vmem>>, %arg4: memref<128x128xf32, #tpu.memory_space<vmem>>, %arg5: memref<1x128xf32, #tpu.memory_space<vmem>>, %arg6: memref<128x128xf32, #tpu.memory_space<vmem>>, %arg7: memref<1x128xf32, #tpu.memory_space<vmem>>, %arg8: memref<128x8xf32, #tpu.memory_space<vmem>>, %arg9: memref<1x8xf32, #tpu.memory_space<vmem>>, %arg10: memref<8x8xf32, #tpu.memory_space<vmem>>) attributes {dimension_semantics = [#tpu.dimension_semantics<parallel>], iteration_bounds = array<i64: 1>, scalar_prefetch = 0 : i64, scratch_operands = 0 : i64, tpu.core_type = #tpu.core_type<tc>, window_params = [{transform_indices = @transform_0, window_bounds = array<i64: 8, 16>}, {pipeline_mode = #tpu.pipeline_mode<synchronous>, transform_indices = @transform_1, window_bounds = array<i64: 16, 128>}, {pipeline_mode = #tpu.pipeline_mode<synchronous>, transform_indices = @transform_2, window_bounds = array<i64: 1, 128>}, {pipeline_mode = #tpu.pipeline_mode<synchronous>, transform_indices = @transform_3, window_bounds = array<i64: 128, 128>}, {pipeline_mode = #tpu.pipeline_mode<synchronous>, transform_indices = @transform_4, window_bounds = array<i64: 1, 128>}, {pipeline_mode = #tpu.pipeline_mode<synchronous>, transform_indices = @transform_5, window_bounds = array<i64: 128, 128>}, {pipeline_mode = #tpu.pipeline_mode<synchronous>, transform_indices = @transform_6, window_bounds = array<i64: 1, 128>}, {pipeline_mode = #tpu.pipeline_mode<synchronous>, transform_indices = @transform_7, window_bounds = array<i64: 128, 8>}, {pipeline_mode = #tpu.pipeline_mode<synchronous>, transform_indices = @transform_8, window_bounds = array<i64: 1, 8>}, {transform_indices = @transform_9, window_bounds = array<i64: 8, 8>}]} {
    %c0 = arith.constant 0 : index
    %c0_0 = arith.constant 0 : index
    %0 = vector.load %arg1[%c0, %c0_0] : memref<8x16xf32, #tpu.memory_space<vmem>>, vector<8x16xf32>
    %c0_1 = arith.constant 0 : index
    %c0_2 = arith.constant 0 : index
    %1 = vector.load %arg2[%c0_1, %c0_2] : memref<16x128xf32, #tpu.memory_space<vmem>>, vector<16x128xf32>
    %cst = arith.constant dense<0.000000e+00> : vector<8x128xf32>
    %2 = tpu.matmul %0, %1, %cst {dimension_numbers = #tpu.dot_dimension_numbers<[1], [0], [0], [1], [0, 0, 1, 1], [], []>} : vector<8x16xf32>, vector<16x128xf32>, vector<8x128xf32> -> vector<8x128xf32>
    %c0_3 = arith.constant 0 : index
    %c0_4 = arith.constant 0 : index
    %3 = vector.load %arg3[%c0_3, %c0_4] : memref<1x128xf32, #tpu.memory_space<vmem>>, vector<1x128xf32>
    %4 = vector.broadcast %3 : vector<1x128xf32> to vector<8x128xf32>
    %5 = arith.addf %2, %4 : vector<8x128xf32>
    %cst_5 = arith.constant 0.000000e+00 : f32
    %6 = vector.broadcast %cst_5 : f32 to vector<8x128xf32>
    %7 = arith.maximumf %5, %6 : vector<8x128xf32>
    %c0_6 = arith.constant 0 : index
    %c0_7 = arith.constant 0 : index
    %8 = vector.load %arg4[%c0_6, %c0_7] : memref<128x128xf32, #tpu.memory_space<vmem>>, vector<128x128xf32>
    %cst_8 = arith.constant dense<0.000000e+00> : vector<8x128xf32>
    %9 = tpu.matmul %7, %8, %cst_8 {dimension_numbers = #tpu.dot_dimension_numbers<[1], [0], [0], [1], [0, 0, 1, 1], [], []>} : vector<8x128xf32>, vector<128x128xf32>, vector<8x128xf32> -> vector<8x128xf32>
    %c0_9 = arith.constant 0 : index
    %c0_10 = arith.constant 0 : index
    %10 = vector.load %arg5[%c0_9, %c0_10] : memref<1x128xf32, #tpu.memory_space<vmem>>, vector<1x128xf32>
    %11 = vector.broadcast %10 : vector<1x128xf32> to vector<8x128xf32>
    %12 = arith.addf %9, %11 : vector<8x128xf32>
    %cst_11 = arith.constant 0.000000e+00 : f32
    %13 = vector.broadcast %cst_11 : f32 to vector<8x128xf32>
    %14 = arith.maximumf %12, %13 : vector<8x128xf32>
    %c0_12 = arith.constant 0 : index
    %c0_13 = arith.constant 0 : index
    %15 = vector.load %arg6[%c0_12, %c0_13] : memref<128x128xf32, #tpu.memory_space<vmem>>, vector<128x128xf32>
    %cst_14 = arith.constant dense<0.000000e+00> : vector<8x128xf32>
    %16 = tpu.matmul %14, %15, %cst_14 {dimension_numbers = #tpu.dot_dimension_numbers<[1], [0], [0], [1], [0, 0, 1, 1], [], []>} : vector<8x128xf32>, vector<128x128xf32>, vector<8x128xf32> -> vector<8x128xf32>
    %c0_15 = arith.constant 0 : index
    %c0_16 = arith.constant 0 : index
    %17 = vector.load %arg7[%c0_15, %c0_16] : memref<1x128xf32, #tpu.memory_space<vmem>>, vector<1x128xf32>
    %18 = vector.broadcast %17 : vector<1x128xf32> to vector<8x128xf32>
    %19 = arith.addf %16, %18 : vector<8x128xf32>
    %cst_17 = arith.constant 0.000000e+00 : f32
    %20 = vector.broadcast %cst_17 : f32 to vector<8x128xf32>
    %21 = arith.maximumf %19, %20 : vector<8x128xf32>
    %c0_18 = arith.constant 0 : index
    %c0_19 = arith.constant 0 : index
    %22 = vector.load %arg8[%c0_18, %c0_19] : memref<128x8xf32, #tpu.memory_space<vmem>>, vector<128x8xf32>
    %cst_20 = arith.constant dense<0.000000e+00> : vector<8x8xf32>
    %23 = tpu.matmul %21, %22, %cst_20 {dimension_numbers = #tpu.dot_dimension_numbers<[1], [0], [0], [1], [0, 0, 1, 1], [], []>} : vector<8x128xf32>, vector<128x8xf32>, vector<8x8xf32> -> vector<8x8xf32>
    %c0_21 = arith.constant 0 : index
    %c0_22 = arith.constant 0 : index
    %24 = vector.load %arg9[%c0_21, %c0_22] : memref<1x8xf32, #tpu.memory_space<vmem>>, vector<1x8xf32>
    %25 = vector.broadcast %24 : vector<1x8xf32> to vector<8x8xf32>
    %26 = arith.addf %23, %25 : vector<8x8xf32>
    %c0_23 = arith.constant 0 : index
    %c0_24 = arith.constant 0 : index
    %27 = vector.load %arg10[%c0_23, %c0_24] : memref<8x8xf32, #tpu.memory_space<vmem>>, vector<8x8xf32>
    tpu.vector_store %arg10[%c0_23, %c0_24], %26 {strides = array<i32>} : memref<8x8xf32, #tpu.memory_space<vmem>>, vector<8x8xf32>,
    return
  }
  func.func @transform_0(%arg0: i32) -> (i32, i32) {
    %c0_i32 = arith.constant 0 : i32
    %c0_i32_0 = arith.constant 0 : i32
    return %arg0, %c0_i32 : i32, i32
  }
  func.func @transform_1(%arg0: i32) -> (i32, i32) {
    %c0_i32 = arith.constant 0 : i32
    %c0_i32_0 = arith.constant 0 : i32
    %c0_i32_1 = arith.constant 0 : i32
    return %c0_i32, %c0_i32_0 : i32, i32
  }
  func.func @transform_2(%arg0: i32) -> (i32, i32) {
    %c0_i32 = arith.constant 0 : i32
    %c0_i32_0 = arith.constant 0 : i32
    %c0_i32_1 = arith.constant 0 : i32
    return %c0_i32, %c0_i32_0 : i32, i32
  }
  func.func @transform_3(%arg0: i32) -> (i32, i32) {
    %c0_i32 = arith.constant 0 : i32
    %c0_i32_0 = arith.constant 0 : i32
    %c0_i32_1 = arith.constant 0 : i32
    return %c0_i32, %c0_i32_0 : i32, i32
  }
  func.func @transform_4(%arg0: i32) -> (i32, i32) {
    %c0_i32 = arith.constant 0 : i32
    %c0_i32_0 = arith.constant 0 : i32
    %c0_i32_1 = arith.constant 0 : i32
    return %c0_i32, %c0_i32_0 : i32, i32
  }
  func.func @transform_5(%arg0: i32) -> (i32, i32) {
    %c0_i32 = arith.constant 0 : i32
    %c0_i32_0 = arith.constant 0 : i32
    %c0_i32_1 = arith.constant 0 : i32
    return %c0_i32, %c0_i32_0 : i32, i32
  }
  func.func @transform_6(%arg0: i32) -> (i32, i32) {
    %c0_i32 = arith.constant 0 : i32
    %c0_i32_0 = arith.constant 0 : i32
    %c0_i32_1 = arith.constant 0 : i32
    return %c0_i32, %c0_i32_0 : i32, i32
  }
  func.func @transform_7(%arg0: i32) -> (i32, i32) {
    %c0_i32 = arith.constant 0 : i32
    %c0_i32_0 = arith.constant 0 : i32
    %c0_i32_1 = arith.constant 0 : i32
    return %c0_i32, %c0_i32_0 : i32, i32
  }
  func.func @transform_8(%arg0: i32) -> (i32, i32) {
    %c0_i32 = arith.constant 0 : i32
    %c0_i32_0 = arith.constant 0 : i32
    %c0_i32_1 = arith.constant 0 : i32
    return %c0_i32, %c0_i32_0 : i32, i32
  }
  func.func @transform_9(%arg0: i32) -> (i32, i32) {
    %c0_i32 = arith.constant 0 : i32
    %c0_i32_0 = arith.constant 0 : i32
    return %arg0, %c0_i32 : i32, i32
  }
}

module attributes {stable_mosaic.version = 11 : i64} {
  func.func @mlp_kernel(%arg0: i32, %arg1: memref<8x16xf32, #tpu.memory_space<vmem>>, %arg2: memref<16x128xf32, #tpu.memory_space<vmem>>, %arg3: memref<1x128xf32, #tpu.memory_space<vmem>>, %arg4: memref<128x128xf32, #tpu.memory_space<vmem>>, %arg5: memref<1x128xf32, #tpu.memory_space<vmem>>, %arg6: memref<128x128xf32, #tpu.memory_space<vmem>>, %arg7: memref<1x128xf32, #tpu.memory_space<vmem>>, %arg8: memref<128x8xf32, #tpu.memory_space<vmem>>, %arg9: memref<1x8xf32, #tpu.memory_space<vmem>>, %arg10: memref<8x8xf32, #tpu.memory_space<vmem>>) attributes {dimension_semantics = [#tpu.dimension_semantics<parallel>], iteration_bounds = array<i64: 1>, scalar_prefetch = 0 : i64, scratch_operands = 0 : i64, tpu.core_type = #tpu.core_type<tc>, window_params = [{transform_indices = @transform_0, window_bounds = array<i64: 8, 16>}, {pipeline_mode = #tpu.pipeline_mode<synchronous>, transform_indices = @transform_1, window_bounds = array<i64: 16, 128>}, {pipeline_mode = #tpu.pipeline_mode<synchronous>, transform_indices = @transform_2, window_bounds = array<i64: 1, 128>}, {pipeline_mode = #tpu.pipeline_mode<synchronous>, transform_indices = @transform_3, window_bounds = array<i64: 128, 128>}, {pipeline_mode = #tpu.pipeline_mode<synchronous>, transform_indices = @transform_4, window_bounds = array<i64: 1, 128>}, {pipeline_mode = #tpu.pipeline_mode<synchronous>, transform_indices = @transform_5, window_bounds = array<i64: 128, 128>}, {pipeline_mode = #tpu.pipeline_mode<synchronous>, transform_indices = @transform_6, window_bounds = array<i64: 1, 128>}, {pipeline_mode = #tpu.pipeline_mode<synchronous>, transform_indices = @transform_7, window_bounds = array<i64: 128, 8>}, {pipeline_mode = #tpu.pipeline_mode<synchronous>, transform_indices = @transform_8, window_bounds = array<i64: 1, 8>}, {transform_indices = @transform_9, window_bounds = array<i64: 8, 8>}]} {
    %c0 = arith.constant 0 : index
    %c0_0 = arith.constant 0 : index
    %0 = vector.load %arg1[%c0, %c0_0] : memref<8x16xf32, #tpu.memory_space<vmem>>, vector<8x16xf32>
    %c0_1 = arith.constant 0 : index
    %c0_2 = arith.constant 0 : index
    %1 = vector.load %arg2[%c0_1, %c0_2] : memref<16x128xf32, #tpu.memory_space<vmem>>, vector<16x128xf32>
    %cst = arith.constant dense<0.000000e+00> : vector<8x128xf32>
    %2 = tpu.matmul %0, %1, %cst {dimension_numbers = #tpu.dot_dimension_numbers<[1], [0], [0], [1], [0, 0, 1, 1], [], []>} : vector<8x16xf32>, vector<16x128xf32>, vector<8x128xf32> -> vector<8x128xf32>
    %c0_3 = arith.constant 0 : index
    %c0_4 = arith.constant 0 : index
    %3 = vector.load %arg3[%c0_3, %c0_4] : memref<1x128xf32, #tpu.memory_space<vmem>>, vector<1x128xf32>
    %4 = vector.broadcast %3 : vector<1x128xf32> to vector<8x128xf32>
    %5 = arith.addf %2, %4 : vector<8x128xf32>
    %cst_5 = arith.constant 0.000000e+00 : f32
    %6 = vector.broadcast %cst_5 : f32 to vector<8x128xf32>
    %7 = arith.maximumf %5, %6 : vector<8x128xf32>
    %c0_6 = arith.constant 0 : index
    %c0_7 = arith.constant 0 : index
    %8 = vector.load %arg4[%c0_6, %c0_7] : memref<128x128xf32, #tpu.memory_space<vmem>>, vector<128x128xf32>
    %cst_8 = arith.constant dense<0.000000e+00> : vector<8x128xf32>
    %9 = tpu.matmul %7, %8, %cst_8 {dimension_numbers = #tpu.dot_dimension_numbers<[1], [0], [0], [1], [0, 0, 1, 1], [], []>} : vector<8x128xf32>, vector<128x128xf32>, vector<8x128xf32> -> vector<8x128xf32>
    %c0_9 = arith.constant 0 : index
    %c0_10 = arith.constant 0 : index
    %10 = vector.load %arg5[%c0_9, %c0_10] : memref<1x128xf32, #tpu.memory_space<vmem>>, vector<1x128xf32>
    %11 = vector.broadcast %10 : vector<1x128xf32> to vector<8x128xf32>
    %12 = arith.addf %9, %11 : vector<8x128xf32>
    %cst_11 = arith.constant 0.000000e+00 : f32
    %13 = vector.broadcast %cst_11 : f32 to vector<8x128xf32>
    %14 = arith.maximumf %12, %13 : vector<8x128xf32>
    %c0_12 = arith.constant 0 : index
    %c0_13 = arith.constant 0 : index
    %15 = vector.load %arg6[%c0_12, %c0_13] : memref<128x128xf32, #tpu.memory_space<vmem>>, vector<128x128xf32>
    %cst_14 = arith.constant dense<0.000000e+00> : vector<8x128xf32>
    %16 = tpu.matmul %14, %15, %cst_14 {dimension_numbers = #tpu.dot_dimension_numbers<[1], [0], [0], [1], [0, 0, 1, 1], [], []>} : vector<8x128xf32>, vector<128x128xf32>, vector<8x128xf32> -> vector<8x128xf32>
    %c0_15 = arith.constant 0 : index
    %c0_16 = arith.constant 0 : index
    %17 = vector.load %arg7[%c0_15, %c0_16] : memref<1x128xf32, #tpu.memory_space<vmem>>, vector<1x128xf32>
    %18 = vector.broadcast %17 : vector<1x128xf32> to vector<8x128xf32>
    %19 = arith.addf %16, %18 : vector<8x128xf32>
    %cst_17 = arith.constant 0.000000e+00 : f32
    %20 = vector.broadcast %cst_17 : f32 to vector<8x128xf32>
    %21 = arith.maximumf %19, %20 : vector<8x128xf32>
    %c0_18 = arith.constant 0 : index
    %c0_19 = arith.constant 0 : index
    %22 = vector.load %arg8[%c0_18, %c0_19] : memref<128x8xf32, #tpu.memory_space<vmem>>, vector<128x8xf32>
    %cst_20 = arith.constant dense<0.000000e+00> : vector<8x8xf32>
    %23 = tpu.matmul %21, %22, %cst_20 {dimension_numbers = #tpu.dot_dimension_numbers<[1], [0], [0], [1], [0, 0, 1, 1], [], []>} : vector<8x128xf32>, vector<128x8xf32>, vector<8x8xf32> -> vector<8x8xf32>
    %c0_21 = arith.constant 0 : index
    %c0_22 = arith.constant 0 : index
    %24 = vector.load %arg9[%c0_21, %c0_22] : memref<1x8xf32, #tpu.memory_space<vmem>>, vector<1x8xf32>
    %25 = vector.broadcast %24 : vector<1x8xf32> to vector<8x8xf32>
    %26 = arith.addf %23, %25 : vector<8x8xf32>
    %c0_23 = arith.constant 0 : index
    %c0_24 = arith.constant 0 : index
    %27 = vector.load %arg10[%c0_23, %c0_24] : memref<8x8xf32, #tpu.memory_space<vmem>>, vector<8x8xf32>
    tpu.vector_store %arg10[%c0_23, %c0_24], %26 {strides = array<i32>} : memref<8x8xf32, #tpu.memory_space<vmem>>, vector<8x8xf32>,
    return
  }
  func.func @transform_0(%arg0: i32) -> (i32, i32) {
    %c0_i32 = arith.constant 0 : i32
    %c0_i32_0 = arith.constant 0 : i32
    return %arg0, %c0_i32 : i32, i32
  }
  func.func @transform_1(%arg0: i32) -> (i32, i32) {
    %c0_i32 = arith.constant 0 : i32
    %c0_i32_0 = arith.constant 0 : i32
    %c0_i32_1 = arith.constant 0 : i32
    return %c0_i32, %c0_i32_0 : i32, i32
  }
  func.func @transform_2(%arg0: i32) -> (i32, i32) {
    %c0_i32 = arith.constant 0 : i32
    %c0_i32_0 = arith.constant 0 : i32
    %c0_i32_1 = arith.constant 0 : i32
    return %c0_i32, %c0_i32_0 : i32, i32
  }
  func.func @transform_3(%arg0: i32) -> (i32, i32) {
    %c0_i32 = arith.constant 0 : i32
    %c0_i32_0 = arith.constant 0 : i32
    %c0_i32_1 = arith.constant 0 : i32
    return %c0_i32, %c0_i32_0 : i32, i32
  }
  func.func @transform_4(%arg0: i32) -> (i32, i32) {
    %c0_i32 = arith.constant 0 : i32
    %c0_i32_0 = arith.constant 0 : i32
    %c0_i32_1 = arith.constant 0 : i32
    return %c0_i32, %c0_i32_0 : i32, i32
  }
  func.func @transform_5(%arg0: i32) -> (i32, i32) {
    %c0_i32 = arith.constant 0 : i32
    %c0_i32_0 = arith.constant 0 : i32
    %c0_i32_1 = arith.constant 0 : i32
    return %c0_i32, %c0_i32_0 : i32, i32
  }
  func.func @transform_6(%arg0: i32) -> (i32, i32) {
    %c0_i32 = arith.constant 0 : i32
    %c0_i32_0 = arith.constant 0 : i32
    %c0_i32_1 = arith.constant 0 : i32
    return %c0_i32, %c0_i32_0 : i32, i32
  }
  func.func @transform_7(%arg0: i32) -> (i32, i32) {
    %c0_i32 = arith.constant 0 : i32
    %c0_i32_0 = arith.constant 0 : i32
    %c0_i32_1 = arith.constant 0 : i32
    return %c0_i32, %c0_i32_0 : i32, i32
  }
  func.func @transform_8(%arg0: i32) -> (i32, i32) {
    %c0_i32 = arith.constant 0 : i32
    %c0_i32_0 = arith.constant 0 : i32
    %c0_i32_1 = arith.constant 0 : i32
    return %c0_i32, %c0_i32_0 : i32, i32
  }
  func.func @transform_9(%arg0: i32) -> (i32, i32) {
    %c0_i32 = arith.constant 0 : i32
    %c0_i32_0 = arith.constant 0 : i32
    return %arg0, %c0_i32 : i32, i32
  }
}

</mosaic_0001>

<bundles_post_ra>
// kernel: tpu_custom_call.1
= control target key start
LH: loop header
LB: loop body
LE: loop exit
PB: predicated region body
PF: predicated region fallthrough
CT: control target
= control target key end

     0   :  { %14 = vsyncpa [#allocation3], 0  ;;  %s1017_s0 = inlined_call_operand.hbm [shape: f32[8,16], index: 0, kind: input, shape index: {}]   ;;  %s1018_s1 = inlined_call_operand.vmem [shape: f32[16,128], index: 1, kind: input, shape index: {}]   ;;  %s1019_s2 = inlined_call_operand.vmem [shape: f32[1,128], index: 2, kind: input, shape index: {}]   ;;  %s1020_s3 = inlined_call_operand.vmem [shape: f32[128,128], index: 3, kind: input, shape index: {}]   ;;  %s1021_s4 = inlined_call_operand.vmem [shape: f32[1,128], index: 4, kind: input, shape index: {}]   ;;  %s1022_s5 = inlined_call_operand.hbm [shape: f32[128,128], index: 5, kind: input, shape index: {}]   ;;  %s1023_s6 = inlined_call_operand.vmem [shape: f32[1,128], index: 6, kind: input, shape index: {}]   ;;  %s1024_s7 = inlined_call_operand.vmem [shape: f32[128,8], index: 7, kind: input, shape index: {}]   ;;  %s1025_s8 = inlined_call_operand.vmem [shape: f32[1,8], index: 8, kind: input, shape index: {}]   ;;  %s1026_s9 = inlined_call_operand.hbm [shape: f32[8,8], index: 9, kind: output, shape index: {}]  }
   0x1   :  { %15 = vsyncpa [#allocation6], 0 }
   0x2   :  { %16 = vsyncpa [#allocation4], 0  ;;  %s769_s30 = smov [#allocation2]   ;;  %s770_s11 = smov [#allocation5]  }
   0x3   :  { %s23_s10 = sshll.u32 %s769_s30, 4  ;;  %s40_s12 = sshll.u32 %s770_s11, 4  ;;  %s24_s10 = int_to_ptr.vmem [resolvable:$true] %s23_s10  ;;  %s827_s12 = int_to_ptr.vmem [resolvable:$true] %s40_s12 }
   0x4   :  { %s697_s15 = scalar_lea.hbm %s1017_s0, 128 }
   0x5   :  { %p698_p0 = scmp.ne.s32.totalorder %s1017_s0, %s697_s15  ;;  %p701_p1 = scmp.lt.u32.totalorder %s697_s15, %s1017_s0 }
   0x7   :  { %p703_p2 = pnand %p701_p1, %p698_p0 }
   0x9   :  { %706 = shalt.err (!%p703_p2)
}
   0xa   :  { %s707_s20 = scalar_lea.vmem %s24_s10, 128  ;;  %p712_p4 = scmp.lt.s32.totalorder %s24_s10, %s24_s10 }
   0xb   :  { %p708_p3 = scmp.ne.s32.totalorder %s24_s10, %s707_s20  ;;  %p713_p5 = scmp.lt.s32.totalorder %s707_s20, %s707_s20 }
   0xd   :  { %p714_p6 = por %p713_p5, %p712_p4 }
   0xf   :  { %p715_p7 = pnand %p714_p6, %p708_p3 }
  0x11   :  { %718 = shalt.err (!%p715_p7)
}
  0x12   :  { %26 = dma.hbm_to_vmem [thread:$0]  %s1017_s0, 128, %s24_s10, [#allocation3]  }
  0x13   :  { %s719_s25 = scalar_lea.hbm %s1022_s5, 2048 }
  0x14   :  { %p720_p8 = scmp.ne.s32.totalorder %s1022_s5, %s719_s25  ;;  %p723_p9 = scmp.lt.u32.totalorder %s719_s25, %s1022_s5 }
  0x16   :  { %p725_p10 = pnand %p723_p9, %p720_p8 }
  0x18   :  { %728 = shalt.err (!%p725_p10)
}
  0x19   :  { %s729_s30 = scalar_lea.vmem %s827_s12, 2048  ;;  %p734_p12 = scmp.lt.s32.totalorder %s827_s12, %s827_s12 }
  0x1a   :  { %p730_p11 = scmp.ne.s32.totalorder %s827_s12, %s729_s30  ;;  %p735_p13 = scmp.lt.s32.totalorder %s729_s30, %s729_s30 }
  0x1c   :  { %p736_p0 = por %p735_p13, %p734_p12 }
  0x1e   :  { %p737_p1 = pnand %p736_p0, %p730_p11 }
  0x20   :  { %740 = shalt.err (!%p737_p1)
}
  0x21   :  { %s771_s0 = smov 128   ;;  %s772_s10 = smov 8  }
  0x22   :  { %46 = dma.hbm_to_vmem [thread:$0]  %s1022_s5, 2048, %s827_s12, [#allocation6], %s771_s0, %s771_s0, %s772_s10  }
  0x23   :  { %763 = dma.done.wait [#allocation3], 128  }
  0x24   :  { %764 = vsyncadd [#allocation3], 4294967168 }
  0x25   :  { %765 = dma.done.wait [#allocation6], 2048  }
  0x26   :  { %766 = vsyncadd [#allocation6], 4294965248  ;;  %v773_v0 = vmov 0.0|0.0   ;;  %vm774_vm0 = vmmov 0   ;;  %v775_v1 = vmov 0.0   ;;  %v60_v2 = vld [vmem:[%s1018_s1] sm:$0xff] }
  0x27   :  { %614 = vmatprep.subr.bf16.mxu0 %v773_v0  ;;  %506 = vmatprep.mubr.msk.f32.mxu0 %vm774_vm0, %v775_v1  ;;  %v61_v3 = vld [vmem:[%s1018_s1 + $0x8] sm:$0xff]  ;;  %v144_v5 = vld [vmem:[%s1020_s3] sm:$0xff]  ;;  %v146_v7 = vld [vmem:[%s1020_s3 + $0x10] sm:$0xff]  ;;  %vm69_vm1 = vcmask 130048   ;;  %s776_s13 = smov [#allocation7]   ;;  %vm425_vm2 = vcmask 64512  }
  0x28   :  { %617 = vmatprep.subr.bf16.mxu1 %v773_v0  ;;  %541 = vmatprep.mubr.msk.f32.mxu1 %vm774_vm0, %v775_v1  ;;  %v615_v4 = vpack.c.bf16 %v61_v3, %v60_v2  ;;  %v145_v6 = vld [vmem:[%s1020_s3 + $0x8] sm:$0xff]  ;;  %v147_v9 = vld [vmem:[%s1020_s3 + $0x18] sm:$0xff]  ;;  %v59_v10 = vld [vmem:[#allocation2] sm:$0xff]  ;;  %s433_s14 = sshll.u32 %s776_s13, 4  ;;  %s434_s14 = int_to_ptr.vmem [resolvable:$true] %s433_s14 }
  0x29   :  { %v618_v8 = vpack.c.bf16 %v145_v6, %v144_v5  ;;  %v621_v11 = vpack.c.bf16 %v147_v9, %v146_v7  ;;  %v148_v12 = vld [vmem:[%s1020_s3 + $0x20] sm:$0xff]  ;;  %v149_v13 = vld [vmem:[%s1020_s3 + $0x28] sm:$0xff]  ;;  %v150_v15 = vld [vmem:[%s1020_s3 + $0x30] sm:$0xff]  ;;  %p746_p3 = scmp.lt.s32.totalorder %s434_s14, %s434_s14 }
  0x2a   :  { %616 = vmatpush3.bf16.msra.mxu0 %v615_v4  ;;  %v624_v14 = vpack.c.bf16 %v149_v13, %v148_v12  ;;  %v151_v16 = vld [vmem:[%s1020_s3 + $0x38] sm:$0xff]  ;;  %v152_v18 = vld [vmem:[%s1020_s3 + $0x40] sm:$0xff]  ;;  %v153_v19 = vld [vmem:[%s1020_s3 + $0x48] sm:$0xff] }
  0x2b   :  { %619 = vmatpush3.bf16.msra.mxu1 %v618_v8  ;;  %641 = vmatprep.subr.bf16.mxu0 %v773_v0  ;;  %v627_v17 = vpack.c.bf16 %v151_v16, %v150_v15  ;;  %v630_v20 = vpack.c.bf16 %v153_v19, %v152_v18  ;;  %v154_v21 = vld [vmem:[%s1020_s3 + $0x50] sm:$0xff]  ;;  %v155_v22 = vld [vmem:[%s1020_s3 + $0x58] sm:$0xff]  ;;  %v156_v24 = vld [vmem:[%s1020_s3 + $0x60] sm:$0xff] }
  0x2c   :  { %620 = vmatprep.subr.bf16.mxu1 %v773_v0  ;;  %v633_v23 = vpack.c.bf16 %v155_v22, %v154_v21  ;;  %v157_v25 = vld [vmem:[%s1020_s3 + $0x68] sm:$0xff]  ;;  %v158_v27 = vld [vmem:[%s1020_s3 + $0x70] sm:$0xff]  ;;  %v159_v28 = vld [vmem:[%s1020_s3 + $0x78] sm:$0xff] }
  0x2d   :  { %507 = vmatmul.mubr.msk.f32.vlgmr.msra.gmra.mrb[0].mxu0 %vm69_vm1, %v59_v10  ;;  %v636_v26 = vpack.c.bf16 %v157_v25, %v156_v24  ;;  %v639_v29 = vpack.c.bf16 %v159_v28, %v158_v27  ;;  %v238_v30 = vld [vmem:[#allocation5] sm:$0xff]  ;;  %v239_v31 = vld [vmem:[#allocation5 + $0x8] sm:$0xff]  ;;  %v240_v32 = vld [vmem:[#allocation5 + $0x10] sm:$0xff] }
  0x2e   :  { %576 = vmatprep.mubr.msk.f32.mxu0 %vm774_vm0, %v775_v1  ;;  %v642_v33 = vpack.c.bf16 %v239_v31, %v238_v30  ;;  %v241_v34 = vld [vmem:[#allocation5 + $0x18] sm:$0xff]  ;;  %v242_v36 = vld [vmem:[#allocation5 + $0x20] sm:$0xff]  ;;  %v243_v37 = vld [vmem:[#allocation5 + $0x28] sm:$0xff] }
  0x2f   :  { %622 = vmatpush3.bf16.msra.mxu1 %v621_v11  ;;  %v645_v35 = vpack.c.bf16 %v241_v34, %v240_v32  ;;  %v648_v38 = vpack.c.bf16 %v243_v37, %v242_v36  ;;  %v244_v39 = vld [vmem:[#allocation5 + $0x30] sm:$0xff]  ;;  %v245_v40 = vld [vmem:[#allocation5 + $0x38] sm:$0xff]  ;;  %v246_v42 = vld [vmem:[#allocation5 + $0x40] sm:$0xff] }
  0x30   :  { %623 = vmatprep.subr.bf16.mxu1 %v773_v0  ;;  %643 = vmatpush3.bf16.msra.mxu0 %v642_v33  ;;  %v651_v41 = vpack.c.bf16 %v245_v40, %v244_v39  ;;  %v247_v43 = vld [vmem:[#allocation5 + $0x48] sm:$0xff]  ;;  %v248_v45 = vld [vmem:[#allocation5 + $0x50] sm:$0xff]  ;;  %v249_v46 = vld [vmem:[#allocation5 + $0x58] sm:$0xff] }
  0x31   :  { %644 = vmatprep.subr.bf16.mxu0 %v773_v0  ;;  %v654_v44 = vpack.c.bf16 %v247_v43, %v246_v42  ;;  %v657_v47 = vpack.c.bf16 %v249_v46, %v248_v45  ;;  %v250_v48 = vld [vmem:[#allocation5 + $0x60] sm:$0xff]  ;;  %v251_v49 = vld [vmem:[#allocation5 + $0x68] sm:$0xff]  ;;  %v443_v51 = vld [vmem:[%s1019_s2] ss:$0 sm:$0xff] }
  0x32   :  { %v660_v50 = vpack.c.bf16 %v251_v49, %v250_v48  ;;  %v252_v56 = vld [vmem:[#allocation5 + $0x70] sm:$0xff]  ;;  %v253_v57 = vld [vmem:[#allocation5 + $0x78] sm:$0xff]  ;;  %v333_v60 = vld [vmem:[%s1024_s7 + $0x8] sm:$0xff] }
  0x33   :  { %625 = vmatpush3.bf16.msra.mxu1 %v624_v14  ;;  %v663_v58 = vpack.c.bf16 %v253_v57, %v252_v56  ;;  %v332_v59 = vld [vmem:[%s1024_s7] sm:$0xff]  ;;  %v334_v61 = vld [vmem:[%s1024_s7 + $0x10] sm:$0xff]  ;;  %v335_v63 = vld [vmem:[%s1024_s7 + $0x18] sm:$0xff] }
  0x34   :  { %626 = vmatprep.subr.bf16.mxu1 %v773_v0  ;;  %646 = vmatpush3.bf16.msra.mxu0 %v645_v35  ;;  %v666_v62 = vpack.c.bf16 %v333_v60, %v332_v59  ;;  %v336_v2 = vld [vmem:[%s1024_s7 + $0x20] sm:$0xff]  ;;  %v337_v3 = vld [vmem:[%s1024_s7 + $0x28] sm:$0xff]  ;;  %v338_v5 = vld [vmem:[%s1024_s7 + $0x30] sm:$0xff] }
  0x35   :  { %647 = vmatprep.subr.bf16.mxu0 %v773_v0  ;;  %v672_v4 = vpack.c.bf16 %v337_v3, %v336_v2  ;;  %v339_v6 = vld [vmem:[%s1024_s7 + $0x38] sm:$0xff]  ;;  %v340_v8 = vld [vmem:[%s1024_s7 + $0x40] sm:$0xff]  ;;  %v341_v9 = vld [vmem:[%s1024_s7 + $0x48] sm:$0xff] }
  0x36   :  { %v675_v7 = vpack.c.bf16 %v339_v6, %v338_v5  ;;  %v678_v10 = vpack.c.bf16 %v341_v9, %v340_v8  ;;  %v342_v11 = vld [vmem:[%s1024_s7 + $0x50] sm:$0xff]  ;;  %v343_v12 = vld [vmem:[%s1024_s7 + $0x58] sm:$0xff]  ;;  %v344_v14 = vld [vmem:[%s1024_s7 + $0x60] sm:$0xff] }
  0x37   :  { %628 = vmatpush3.bf16.msra.mxu1 %v627_v17  ;;  %v681_v13 = vpack.c.bf16 %v343_v12, %v342_v11  ;;  %v345_v15 = vld [vmem:[%s1024_s7 + $0x68] sm:$0xff]  ;;  %v445_v17 = vld [vmem:[%s1021_s4] ss:$0 sm:$0xff]  ;;  %v346_v22 = vld [vmem:[%s1024_s7 + $0x70] sm:$0xff] }
  0x38   :  { %629 = vmatprep.subr.bf16.mxu1 %v773_v0  ;;  %649 = vmatpush3.bf16.msra.mxu0 %v648_v38  ;;  %v684_v16 = vpack.c.bf16 %v345_v15, %v344_v14 }
  0x39   :  { %650 = vmatprep.subr.bf16.mxu0 %v773_v0 }
  0x3b   :  { %631 = vmatpush3.bf16.msra.mxu1 %v630_v20 }
  0x3c   :  { %632 = vmatprep.subr.bf16.mxu1 %v773_v0  ;;  %652 = vmatpush3.bf16.msra.mxu0 %v651_v41 }
  0x3d   :  { %653 = vmatprep.subr.bf16.mxu0 %v773_v0 }
  0x3f   :  { %634 = vmatpush3.bf16.msra.mxu1 %v633_v23  ;;  %v347_v23 = vld [vmem:[%s1024_s7 + $0x78] sm:$0xff]  ;;  %s741_s7 = scalar_lea.vmem %s434_s14, 128 }
  0x40   :  { %635 = vmatprep.subr.bf16.mxu1 %v773_v0  ;;  %655 = vmatpush3.bf16.msra.mxu0 %v654_v44  ;;  %v687_v24 = vpack.c.bf16 %v347_v23, %v346_v22  ;;  %p742_p2 = scmp.ne.s32.totalorder %s434_s14, %s741_s7  ;;  %p747_p4 = scmp.lt.s32.totalorder %s741_s7, %s741_s7 }
  0x41   :  { %656 = vmatprep.subr.bf16.mxu0 %v773_v0 }
  0x42   :  { %p748_p5 = por %p747_p4, %p746_p3 }
  0x43   :  { %637 = vmatpush3.bf16.msra.mxu1 %v636_v26 }
  0x44   :  { %638 = vmatprep.subr.bf16.mxu1 %v773_v0  ;;  %658 = vmatpush3.bf16.msra.mxu0 %v657_v47  ;;  %p749_p6 = pnand %p748_p5, %p742_p2 }
  0x45   :  { %659 = vmatprep.subr.bf16.mxu0 %v773_v0 }
  0x47   :  { %640 = vmatpush3.bf16.msra.mxu1 %v639_v29  ;;  %v447_v29 = vld [vmem:[%s1025_s8] ss:$0 sm:$0xff] }
  0x48   :  { %665 = vmatprep.subr.bf16.mxu1 %v773_v0  ;;  %661 = vmatpush3.bf16.msra.mxu0 %v660_v50 }
  0x49   :  { %662 = vmatprep.subr.bf16.mxu0 %v773_v0 }
  0x4c   :  { %664 = vmatpush3.bf16.msra.mxu0 %v663_v58 }
 0x100   :  { %v139_v52 = vpop.f32.mrb[0].mxu0 }
 0x101   :  { %v140_v53 = vadd.f32 %v443_v51, %v139_v52  ;;  %v508_v54 = vpop.f32.mrb[1].mxu0 }
 0x103   :  { %v143_v55 = vmax.f32 %v140_v53, 0.0 }
 0x105   :  { %542 = vmatmul.mubr.f32.vlgmr.msra.gmra.mrb[0].mxu1 %v143_v55 }
 0x106   :  { %611 = vmatprep.mubr.msk.f32.mxu1 %vm774_vm0, %v775_v1  ;;  %667 = vmatpush3.bf16.msra.mxu1 %v666_v62  ;;  %v669_v1 = vpack.c.bf16 %v335_v63, %v334_v61 }
 0x107   :  { %668 = vmatprep.subr.bf16.mxu1 %v773_v0 }
 0x10a   :  { %670 = vmatpush3.bf16.msra.mxu1 %v669_v1 }
 0x10b   :  { %671 = vmatprep.subr.bf16.mxu1 %v773_v0 }
 0x10e   :  { %673 = vmatpush3.bf16.msra.mxu1 %v672_v4 }
 0x10f   :  { %674 = vmatprep.subr.bf16.mxu1 %v773_v0 }
 0x112   :  { %676 = vmatpush3.bf16.msra.mxu1 %v675_v7 }
 0x113   :  { %677 = vmatprep.subr.bf16.mxu1 %v773_v0 }
 0x116   :  { %679 = vmatpush3.bf16.msra.mxu1 %v678_v10 }
 0x117   :  { %680 = vmatprep.subr.bf16.mxu1 %v773_v0 }
 0x11a   :  { %682 = vmatpush3.bf16.msra.mxu1 %v681_v13 }
 0x11b   :  { %683 = vmatprep.subr.bf16.mxu1 %v773_v0 }
 0x11e   :  { %685 = vmatpush3.bf16.msra.mxu1 %v684_v16 }
 0x11f   :  { %686 = vmatprep.subr.bf16.mxu1 %v773_v0  ;;  %v446_v0 = vld [vmem:[%s1023_s6] ss:$0 sm:$0xff] }
 0x122   :  { %688 = vmatpush3.bf16.msra.mxu1 %v687_v24 }
 0x1d8   :  { %v233_v18 = vpop.f32.mrb[0].mxu1 }
 0x1d9   :  { %v234_v19 = vadd.f32 %v445_v17, %v233_v18  ;;  %v543_v20 = vpop.f32.mrb[1].mxu1 }
 0x1db   :  { %v237_v21 = vmax.f32 %v234_v19, 0.0 }
 0x1dd   :  { %577 = vmatmul.mubr.f32.vlgmr.msra.gmra.mrb[2].mxu0 %v237_v21 }
 0x2b0   :  { %v327_v25 = vpop.f32.mrb[2].mxu0 }
 0x2b1   :  { %v328_v26 = vadd.f32 %v446_v0, %v327_v25  ;;  %v578_v27 = vpop.f32.mrb[3].mxu0 }
 0x2b3   :  { %v331_v28 = vmax.f32 %v328_v26, 0.0 }
 0x2b5   :  { %612 = vmatmul.mubr.f32.vlgmr.msra.gmra.mrb[2].mxu1 %v331_v28 }
 0x388   :  { %v421_v30 = vpop.f32.mrb[2].mxu1 }
 0x389   :  { %v422_v31 = vadd.f32 %v447_v29, %v421_v30  ;;  %v613_v32 = vpop.f32.mrb[3].mxu1 }
 0x38b   :  { %426 = vst.msk [vmem:[#allocation7] sm:$0xff] %vm425_vm2, %v422_v31 }
 0x38c   :  { %752 = shalt.err (!%p749_p6)
}
 0x38d   :  { %s753_s5 = scalar_lea.hbm %s1026_s9, 128 }
 0x38e   :  { %p754_p7 = scmp.ne.s32.totalorder %s1026_s9, %s753_s5  ;;  %p757_p8 = scmp.lt.u32.totalorder %s753_s5, %s1026_s9 }
 0x390   :  { %p759_p9 = pnand %p757_p8, %p754_p7 }
 0x392   :  { %762 = shalt.err (!%p759_p9)
}
 0x393   :  { %436 = dma.vmem_to_hbm [thread:$0]  %s434_s14, 128, %s1026_s9, [#allocation4]  }
 0x394   :  { %767 = dma.done.wait [#allocation4], 128  }
 0x395   :  { %768 = vsyncadd [#allocation4], 4294967168 }
 0x396   :  { %440 = vsyncpa [#allocation3], 1 }
 0x397   :  { %441 = vsyncpa [#allocation6], 1 }
 0x398   :  { %442 = vsyncpa [#allocation4], 1 }

// kernel: tpu_custom_call.1
= control target key start
LH: loop header
LB: loop body
LE: loop exit
PB: predicated region body
PF: predicated region fallthrough
CT: control target
= control target key end

     0   :  { %14 = vsyncpa [#allocation3], 0  ;;  %s1017_s0 = inlined_call_operand.hbm [shape: f32[8,16], index: 0, kind: input, shape index: {}]   ;;  %s1018_s1 = inlined_call_operand.vmem [shape: f32[16,128], index: 1, kind: input, shape index: {}]   ;;  %s1019_s2 = inlined_call_operand.vmem [shape: f32[1,128], index: 2, kind: input, shape index: {}]   ;;  %s1020_s3 = inlined_call_operand.vmem [shape: f32[128,128], index: 3, kind: input, shape index: {}]   ;;  %s1021_s4 = inlined_call_operand.vmem [shape: f32[1,128], index: 4, kind: input, shape index: {}]   ;;  %s1022_s5 = inlined_call_operand.hbm [shape: f32[128,128], index: 5, kind: input, shape index: {}]   ;;  %s1023_s6 = inlined_call_operand.vmem [shape: f32[1,128], index: 6, kind: input, shape index: {}]   ;;  %s1024_s7 = inlined_call_operand.vmem [shape: f32[128,8], index: 7, kind: input, shape index: {}]   ;;  %s1025_s8 = inlined_call_operand.vmem [shape: f32[1,8], index: 8, kind: input, shape index: {}]   ;;  %s1026_s9 = inlined_call_operand.hbm [shape: f32[8,8], index: 9, kind: output, shape index: {}]  }
   0x1   :  { %15 = vsyncpa [#allocation6], 0 }
   0x2   :  { %16 = vsyncpa [#allocation4], 0  ;;  %s769_s30 = smov [#allocation2]   ;;  %s770_s11 = smov [#allocation5]  }
   0x3   :  { %s23_s10 = sshll.u32 %s769_s30, 4  ;;  %s40_s12 = sshll.u32 %s770_s11, 4  ;;  %s24_s10 = int_to_ptr.vmem [resolvable:$true] %s23_s10  ;;  %s827_s12 = int_to_ptr.vmem [resolvable:$true] %s40_s12 }
   0x4   :  { %s697_s15 = scalar_lea.hbm %s1017_s0, 128 }
   0x5   :  { %p698_p0 = scmp.ne.s32.totalorder %s1017_s0, %s697_s15  ;;  %p701_p1 = scmp.lt.u32.totalorder %s697_s15, %s1017_s0 }
   0x7   :  { %p703_p2 = pnand %p701_p1, %p698_p0 }
   0x9   :  { %706 = shalt.err (!%p703_p2)
}
   0xa   :  { %s707_s20 = scalar_lea.vmem %s24_s10, 128  ;;  %p712_p4 = scmp.lt.s32.totalorder %s24_s10, %s24_s10 }
   0xb   :  { %p708_p3 = scmp.ne.s32.totalorder %s24_s10, %s707_s20  ;;  %p713_p5 = scmp.lt.s32.totalorder %s707_s20, %s707_s20 }
   0xd   :  { %p714_p6 = por %p713_p5, %p712_p4 }
   0xf   :  { %p715_p7 = pnand %p714_p6, %p708_p3 }
  0x11   :  { %718 = shalt.err (!%p715_p7)
}
  0x12   :  { %26 = dma.hbm_to_vmem [thread:$0]  %s1017_s0, 128, %s24_s10, [#allocation3]  }
  0x13   :  { %s719_s25 = scalar_lea.hbm %s1022_s5, 2048 }
  0x14   :  { %p720_p8 = scmp.ne.s32.totalorder %s1022_s5, %s719_s25  ;;  %p723_p9 = scmp.lt.u32.totalorder %s719_s25, %s1022_s5 }
  0x16   :  { %p725_p10 = pnand %p723_p9, %p720_p8 }
  0x18   :  { %728 = shalt.err (!%p725_p10)
}
  0x19   :  { %s729_s30 = scalar_lea.vmem %s827_s12, 2048  ;;  %p734_p12 = scmp.lt.s32.totalorder %s827_s12, %s827_s12 }
  0x1a   :  { %p730_p11 = scmp.ne.s32.totalorder %s827_s12, %s729_s30  ;;  %p735_p13 = scmp.lt.s32.totalorder %s729_s30, %s729_s30 }
  0x1c   :  { %p736_p0 = por %p735_p13, %p734_p12 }
  0x1e   :  { %p737_p1 = pnand %p736_p0, %p730_p11 }
  0x20   :  { %740 = shalt.err (!%p737_p1)
}
  0x21   :  { %s771_s0 = smov 128   ;;  %s772_s10 = smov 8  }
  0x22   :  { %46 = dma.hbm_to_vmem [thread:$0]  %s1022_s5, 2048, %s827_s12, [#allocation6], %s771_s0, %s771_s0, %s772_s10  }
  0x23   :  { %763 = dma.done.wait [#allocation3], 128  }
  0x24   :  { %764 = vsyncadd [#allocation3], 4294967168 }
  0x25   :  { %765 = dma.done.wait [#allocation6], 2048  }
  0x26   :  { %766 = vsyncadd [#allocation6], 4294965248  ;;  %v773_v0 = vmov 0.0|0.0   ;;  %vm774_vm0 = vmmov 0   ;;  %v775_v1 = vmov 0.0   ;;  %v60_v2 = vld [vmem:[%s1018_s1] sm:$0xff] }
  0x27   :  { %614 = vmatprep.subr.bf16.mxu0 %v773_v0  ;;  %506 = vmatprep.mubr.msk.f32.mxu0 %vm774_vm0, %v775_v1  ;;  %v61_v3 = vld [vmem:[%s1018_s1 + $0x8] sm:$0xff]  ;;  %v144_v5 = vld [vmem:[%s1020_s3] sm:$0xff]  ;;  %v146_v7 = vld [vmem:[%s1020_s3 + $0x10] sm:$0xff]  ;;  %vm69_vm1 = vcmask 130048   ;;  %s776_s13 = smov [#allocation7]   ;;  %vm425_vm2 = vcmask 64512  }
  0x28   :  { %617 = vmatprep.subr.bf16.mxu1 %v773_v0  ;;  %541 = vmatprep.mubr.msk.f32.mxu1 %vm774_vm0, %v775_v1  ;;  %v615_v4 = vpack.c.bf16 %v61_v3, %v60_v2  ;;  %v145_v6 = vld [vmem:[%s1020_s3 + $0x8] sm:$0xff]  ;;  %v147_v9 = vld [vmem:[%s1020_s3 + $0x18] sm:$0xff]  ;;  %v59_v10 = vld [vmem:[#allocation2] sm:$0xff]  ;;  %s433_s14 = sshll.u32 %s776_s13, 4  ;;  %s434_s14 = int_to_ptr.vmem [resolvable:$true] %s433_s14 }
  0x29   :  { %v618_v8 = vpack.c.bf16 %v145_v6, %v144_v5  ;;  %v621_v11 = vpack.c.bf16 %v147_v9, %v146_v7  ;;  %v148_v12 = vld [vmem:[%s1020_s3 + $0x20] sm:$0xff]  ;;  %v149_v13 = vld [vmem:[%s1020_s3 + $0x28] sm:$0xff]  ;;  %v150_v15 = vld [vmem:[%s1020_s3 + $0x30] sm:$0xff]  ;;  %p746_p3 = scmp.lt.s32.totalorder %s434_s14, %s434_s14 }
  0x2a   :  { %616 = vmatpush3.bf16.msra.mxu0 %v615_v4  ;;  %v624_v14 = vpack.c.bf16 %v149_v13, %v148_v12  ;;  %v151_v16 = vld [vmem:[%s1020_s3 + $0x38] sm:$0xff]  ;;  %v152_v18 = vld [vmem:[%s1020_s3 + $0x40] sm:$0xff]  ;;  %v153_v19 = vld [vmem:[%s1020_s3 + $0x48] sm:$0xff] }
  0x2b   :  { %619 = vmatpush3.bf16.msra.mxu1 %v618_v8  ;;  %641 = vmatprep.subr.bf16.mxu0 %v773_v0  ;;  %v627_v17 = vpack.c.bf16 %v151_v16, %v150_v15  ;;  %v630_v20 = vpack.c.bf16 %v153_v19, %v152_v18  ;;  %v154_v21 = vld [vmem:[%s1020_s3 + $0x50] sm:$0xff]  ;;  %v155_v22 = vld [vmem:[%s1020_s3 + $0x58] sm:$0xff]  ;;  %v156_v24 = vld [vmem:[%s1020_s3 + $0x60] sm:$0xff] }
  0x2c   :  { %620 = vmatprep.subr.bf16.mxu1 %v773_v0  ;;  %v633_v23 = vpack.c.bf16 %v155_v22, %v154_v21  ;;  %v157_v25 = vld [vmem:[%s1020_s3 + $0x68] sm:$0xff]  ;;  %v158_v27 = vld [vmem:[%s1020_s3 + $0x70] sm:$0xff]  ;;  %v159_v28 = vld [vmem:[%s1020_s3 + $0x78] sm:$0xff] }
  0x2d   :  { %507 = vmatmul.mubr.msk.f32.vlgmr.msra.gmra.mrb[0].mxu0 %vm69_vm1, %v59_v10  ;;  %v636_v26 = vpack.c.bf16 %v157_v25, %v156_v24  ;;  %v639_v29 = vpack.c.bf16 %v159_v28, %v158_v27  ;;  %v238_v30 = vld [vmem:[#allocation5] sm:$0xff]  ;;  %v239_v31 = vld [vmem:[#allocation5 + $0x8] sm:$0xff]  ;;  %v240_v32 = vld [vmem:[#allocation5 + $0x10] sm:$0xff] }
  0x2e   :  { %576 = vmatprep.mubr.msk.f32.mxu0 %vm774_vm0, %v775_v1  ;;  %v642_v33 = vpack.c.bf16 %v239_v31, %v238_v30  ;;  %v241_v34 = vld [vmem:[#allocation5 + $0x18] sm:$0xff]  ;;  %v242_v36 = vld [vmem:[#allocation5 + $0x20] sm:$0xff]  ;;  %v243_v37 = vld [vmem:[#allocation5 + $0x28] sm:$0xff] }
  0x2f   :  { %622 = vmatpush3.bf16.msra.mxu1 %v621_v11  ;;  %v645_v35 = vpack.c.bf16 %v241_v34, %v240_v32  ;;  %v648_v38 = vpack.c.bf16 %v243_v37, %v242_v36  ;;  %v244_v39 = vld [vmem:[#allocation5 + $0x30] sm:$0xff]  ;;  %v245_v40 = vld [vmem:[#allocation5 + $0x38] sm:$0xff]  ;;  %v246_v42 = vld [vmem:[#allocation5 + $0x40] sm:$0xff] }
  0x30   :  { %623 = vmatprep.subr.bf16.mxu1 %v773_v0  ;;  %643 = vmatpush3.bf16.msra.mxu0 %v642_v33  ;;  %v651_v41 = vpack.c.bf16 %v245_v40, %v244_v39  ;;  %v247_v43 = vld [vmem:[#allocation5 + $0x48] sm:$0xff]  ;;  %v248_v45 = vld [vmem:[#allocation5 + $0x50] sm:$0xff]  ;;  %v249_v46 = vld [vmem:[#allocation5 + $0x58] sm:$0xff] }
  0x31   :  { %644 = vmatprep.subr.bf16.mxu0 %v773_v0  ;;  %v654_v44 = vpack.c.bf16 %v247_v43, %v246_v42  ;;  %v657_v47 = vpack.c.bf16 %v249_v46, %v248_v45  ;;  %v250_v48 = vld [vmem:[#allocation5 + $0x60] sm:$0xff]  ;;  %v251_v49 = vld [vmem:[#allocation5 + $0x68] sm:$0xff]  ;;  %v443_v51 = vld [vmem:[%s1019_s2] ss:$0 sm:$0xff] }
  0x32   :  { %v660_v50 = vpack.c.bf16 %v251_v49, %v250_v48  ;;  %v252_v56 = vld [vmem:[#allocation5 + $0x70] sm:$0xff]  ;;  %v253_v57 = vld [vmem:[#allocation5 + $0x78] sm:$0xff]  ;;  %v333_v60 = vld [vmem:[%s1024_s7 + $0x8] sm:$0xff] }
  0x33   :  { %625 = vmatpush3.bf16.msra.mxu1 %v624_v14  ;;  %v663_v58 = vpack.c.bf16 %v253_v57, %v252_v56  ;;  %v332_v59 = vld [vmem:[%s1024_s7] sm:$0xff]  ;;  %v334_v61 = vld [vmem:[%s1024_s7 + $0x10] sm:$0xff]  ;;  %v335_v63 = vld [vmem:[%s1024_s7 + $0x18] sm:$0xff] }
  0x34   :  { %626 = vmatprep.subr.bf16.mxu1 %v773_v0  ;;  %646 = vmatpush3.bf16.msra.mxu0 %v645_v35  ;;  %v666_v62 = vpack.c.bf16 %v333_v60, %v332_v59  ;;  %v336_v2 = vld [vmem:[%s1024_s7 + $0x20] sm:$0xff]  ;;  %v337_v3 = vld [vmem:[%s1024_s7 + $0x28] sm:$0xff]  ;;  %v338_v5 = vld [vmem:[%s1024_s7 + $0x30] sm:$0xff] }
  0x35   :  { %647 = vmatprep.subr.bf16.mxu0 %v773_v0  ;;  %v672_v4 = vpack.c.bf16 %v337_v3, %v336_v2  ;;  %v339_v6 = vld [vmem:[%s1024_s7 + $0x38] sm:$0xff]  ;;  %v340_v8 = vld [vmem:[%s1024_s7 + $0x40] sm:$0xff]  ;;  %v341_v9 = vld [vmem:[%s1024_s7 + $0x48] sm:$0xff] }
  0x36   :  { %v675_v7 = vpack.c.bf16 %v339_v6, %v338_v5  ;;  %v678_v10 = vpack.c.bf16 %v341_v9, %v340_v8  ;;  %v342_v11 = vld [vmem:[%s1024_s7 + $0x50] sm:$0xff]  ;;  %v343_v12 = vld [vmem:[%s1024_s7 + $0x58] sm:$0xff]  ;;  %v344_v14 = vld [vmem:[%s1024_s7 + $0x60] sm:$0xff] }
  0x37   :  { %628 = vmatpush3.bf16.msra.mxu1 %v627_v17  ;;  %v681_v13 = vpack.c.bf16 %v343_v12, %v342_v11  ;;  %v345_v15 = vld [vmem:[%s1024_s7 + $0x68] sm:$0xff]  ;;  %v445_v17 = vld [vmem:[%s1021_s4] ss:$0 sm:$0xff]  ;;  %v346_v22 = vld [vmem:[%s1024_s7 + $0x70] sm:$0xff] }
  0x38   :  { %629 = vmatprep.subr.bf16.mxu1 %v773_v0  ;;  %649 = vmatpush3.bf16.msra.mxu0 %v648_v38  ;;  %v684_v16 = vpack.c.bf16 %v345_v15, %v344_v14 }
  0x39   :  { %650 = vmatprep.subr.bf16.mxu0 %v773_v0 }
  0x3b   :  { %631 = vmatpush3.bf16.msra.mxu1 %v630_v20 }
  0x3c   :  { %632 = vmatprep.subr.bf16.mxu1 %v773_v0  ;;  %652 = vmatpush3.bf16.msra.mxu0 %v651_v41 }
  0x3d   :  { %653 = vmatprep.subr.bf16.mxu0 %v773_v0 }
  0x3f   :  { %634 = vmatpush3.bf16.msra.mxu1 %v633_v23  ;;  %v347_v23 = vld [vmem:[%s1024_s7 + $0x78] sm:$0xff]  ;;  %s741_s7 = scalar_lea.vmem %s434_s14, 128 }
  0x40   :  { %635 = vmatprep.subr.bf16.mxu1 %v773_v0  ;;  %655 = vmatpush3.bf16.msra.mxu0 %v654_v44  ;;  %v687_v24 = vpack.c.bf16 %v347_v23, %v346_v22  ;;  %p742_p2 = scmp.ne.s32.totalorder %s434_s14, %s741_s7  ;;  %p747_p4 = scmp.lt.s32.totalorder %s741_s7, %s741_s7 }
  0x41   :  { %656 = vmatprep.subr.bf16.mxu0 %v773_v0 }
  0x42   :  { %p748_p5 = por %p747_p4, %p746_p3 }
  0x43   :  { %637 = vmatpush3.bf16.msra.mxu1 %v636_v26 }
  0x44   :  { %638 = vmatprep.subr.bf16.mxu1 %v773_v0  ;;  %658 = vmatpush3.bf16.msra.mxu0 %v657_v47  ;;  %p749_p6 = pnand %p748_p5, %p742_p2 }
  0x45   :  { %659 = vmatprep.subr.bf16.mxu0 %v773_v0 }
  0x47   :  { %640 = vmatpush3.bf16.msra.mxu1 %v639_v29  ;;  %v447_v29 = vld [vmem:[%s1025_s8] ss:$0 sm:$0xff] }
  0x48   :  { %665 = vmatprep.subr.bf16.mxu1 %v773_v0  ;;  %661 = vmatpush3.bf16.msra.mxu0 %v660_v50 }
  0x49   :  { %662 = vmatprep.subr.bf16.mxu0 %v773_v0 }
  0x4c   :  { %664 = vmatpush3.bf16.msra.mxu0 %v663_v58 }
 0x100   :  { %v139_v52 = vpop.f32.mrb[0].mxu0 }
 0x101   :  { %v140_v53 = vadd.f32 %v443_v51, %v139_v52  ;;  %v508_v54 = vpop.f32.mrb[1].mxu0 }
 0x103   :  { %v143_v55 = vmax.f32 %v140_v53, 0.0 }
 0x105   :  { %542 = vmatmul.mubr.f32.vlgmr.msra.gmra.mrb[0].mxu1 %v143_v55 }
 0x106   :  { %611 = vmatprep.mubr.msk.f32.mxu1 %vm774_vm0, %v775_v1  ;;  %667 = vmatpush3.bf16.msra.mxu1 %v666_v62  ;;  %v669_v1 = vpack.c.bf16 %v335_v63, %v334_v61 }
 0x107   :  { %668 = vmatprep.subr.bf16.mxu1 %v773_v0 }
 0x10a   :  { %670 = vmatpush3.bf16.msra.mxu1 %v669_v1 }
 0x10b   :  { %671 = vmatprep.subr.bf16.mxu1 %v773_v0 }
 0x10e   :  { %673 = vmatpush3.bf16.msra.mxu1 %v672_v4 }
 0x10f   :  { %674 = vmatprep.subr.bf16.mxu1 %v773_v0 }
 0x112   :  { %676 = vmatpush3.bf16.msra.mxu1 %v675_v7 }
 0x113   :  { %677 = vmatprep.subr.bf16.mxu1 %v773_v0 }
 0x116   :  { %679 = vmatpush3.bf16.msra.mxu1 %v678_v10 }
 0x117   :  { %680 = vmatprep.subr.bf16.mxu1 %v773_v0 }
 0x11a   :  { %682 = vmatpush3.bf16.msra.mxu1 %v681_v13 }
 0x11b   :  { %683 = vmatprep.subr.bf16.mxu1 %v773_v0 }
 0x11e   :  { %685 = vmatpush3.bf16.msra.mxu1 %v684_v16 }
 0x11f   :  { %686 = vmatprep.subr.bf16.mxu1 %v773_v0  ;;  %v446_v0 = vld [vmem:[%s1023_s6] ss:$0 sm:$0xff] }
 0x122   :  { %688 = vmatpush3.bf16.msra.mxu1 %v687_v24 }
 0x1d8   :  { %v233_v18 = vpop.f32.mrb[0].mxu1 }
 0x1d9   :  { %v234_v19 = vadd.f32 %v445_v17, %v233_v18  ;;  %v543_v20 = vpop.f32.mrb[1].mxu1 }
 0x1db   :  { %v237_v21 = vmax.f32 %v234_v19, 0.0 }
 0x1dd   :  { %577 = vmatmul.mubr.f32.vlgmr.msra.gmra.mrb[2].mxu0 %v237_v21 }
 0x2b0   :  { %v327_v25 = vpop.f32.mrb[2].mxu0 }
 0x2b1   :  { %v328_v26 = vadd.f32 %v446_v0, %v327_v25  ;;  %v578_v27 = vpop.f32.mrb[3].mxu0 }
 0x2b3   :  { %v331_v28 = vmax.f32 %v328_v26, 0.0 }
 0x2b5   :  { %612 = vmatmul.mubr.f32.vlgmr.msra.gmra.mrb[2].mxu1 %v331_v28 }
 0x388   :  { %v421_v30 = vpop.f32.mrb[2].mxu1 }
 0x389   :  { %v422_v31 = vadd.f32 %v447_v29, %v421_v30  ;;  %v613_v32 = vpop.f32.mrb[3].mxu1 }
 0x38b   :  { %426 = vst.msk [vmem:[#allocation7] sm:$0xff] %vm425_vm2, %v422_v31 }
 0x38c   :  { %752 = shalt.err (!%p749_p6)
}
 0x38d   :  { %s753_s5 = scalar_lea.hbm %s1026_s9, 128 }
 0x38e   :  { %p754_p7 = scmp.ne.s32.totalorder %s1026_s9, %s753_s5  ;;  %p757_p8 = scmp.lt.u32.totalorder %s753_s5, %s1026_s9 }
 0x390   :  { %p759_p9 = pnand %p757_p8, %p754_p7 }
 0x392   :  { %762 = shalt.err (!%p759_p9)
}
 0x393   :  { %436 = dma.vmem_to_hbm [thread:$0]  %s434_s14, 128, %s1026_s9, [#allocation4]  }
 0x394   :  { %767 = dma.done.wait [#allocation4], 128  }
 0x395   :  { %768 = vsyncadd [#allocation4], 4294967168 }
 0x396   :  { %440 = vsyncpa [#allocation3], 1 }
 0x397   :  { %441 = vsyncpa [#allocation6], 1 }
 0x398   :  { %442 = vsyncpa [#allocation4], 1 }

</bundles_post_ra>
